<compile_context>
chip_gen: v7x
topology: tpu7x:2x2x1
jax: 0.10.0
libtpu: 0.0.40
codegen_flags: <defaults>
</compile_context>

<pallas_src>
import jax
import jax.numpy as jnp
from jax.experimental import pallas as pl
from jax.experimental.pallas import tpu as pltpu


def _round_up(x, m):
    return ((x + m - 1) // m) * m


def gate_kernel(x_ref, w_ref, b_ref, o_ref):
    # MXU matmul with f32 accumulation, then bias add + sigmoid (VPU/EUP),
    # all on full (8,128)-aligned vregs in VMEM.
    z = jnp.dot(x_ref[...], w_ref[...], preferred_element_type=jnp.float32)
    z = z + b_ref[...]                      # (TILE_B, OUT_p) + (1, OUT_p)
    o_ref[...] = jax.nn.sigmoid(z).astype(o_ref.dtype)


def pack_params(w, b):
    """Pad weight (IN, OUT) and bias (OUT,) to 128-aligned shapes, once.

    Zero padding is exact: padded K rows contribute 0 to the dot and padded
    N columns are sliced off in the wrapper.
    """
    IN, OUT = w.shape
    in_p = _round_up(IN, 128)
    out_p = _round_up(OUT, 128)
    w_p = jnp.zeros((in_p, out_p), w.dtype).at[:IN, :OUT].set(w)
    b_p = jnp.zeros((1, out_p), b.dtype).at[0, :OUT].set(b)
    return w_p, b_p


def gate_network(x, w_packed, b_packed, out_size, *, tile_b=256,
                 mxu_dtype=None):
    """y = sigmoid(x @ W + b).

    x:        (B, IN) float32
    w_packed: (IN_pad, OUT_pad) from pack_params
    b_packed: (1, OUT_pad) from pack_params
    out_size: logical OUT (columns to keep)
    mxu_dtype: optionally jnp.bfloat16 on v6e/v7x to feed the MXU bf16 with
               f32 accumulation; bias add + sigmoid always stay f32.
    """
    B, IN = x.shape
    in_p, out_p = w_packed.shape

    # Batch tiling: tiles are multiples of 8 sublanes; pad B so it divides
    # evenly into full tiles (no partial blocks).
    b_pad = _round_up(max(B, 8), 8)
    tile_b = max(8, min(_round_up(tile_b, 8), b_pad))
    b_pad = _round_up(b_pad, tile_b)
    grid_b = pl.cdiv(b_pad, tile_b)

    x_p = jnp.zeros((b_pad, in_p), x.dtype).at[:B, :IN].set(x)

    w_in = w_packed
    if mxu_dtype is not None:
        x_p = x_p.astype(mxu_dtype)
        w_in = w_packed.astype(mxu_dtype)

    out_padded = pl.pallas_call(
        gate_kernel,
        out_shape=jax.ShapeDtypeStruct((b_pad, out_p), jnp.float32),
        grid=(grid_b,),
        in_specs=[
            pl.BlockSpec((tile_b, in_p), lambda i: (i, 0)),   # x: tiled rows
            pl.BlockSpec((in_p, out_p), lambda i: (0, 0)),    # W: resident
            pl.BlockSpec((1, out_p), lambda i: (0, 0)),       # b: resident
        ],
        out_specs=pl.BlockSpec((tile_b, out_p), lambda i: (i, 0)),
        compiler_params=pltpu.CompilerParams(
            dimension_semantics=("parallel",)),
    )(x_p, w_in, b_packed)

    return out_padded[:B, :out_size]


def init_params(key, input_size, output_size):
    # Deterministic init mimicking nn.Linear: U(-1/sqrt(in), 1/sqrt(in)).
    kw, kb = jax.random.split(key)
    bound = 1.0 / jnp.sqrt(jnp.float32(input_size))
    # PyTorch stores weight as (out, in); we keep the transposed (in, out)
    # layout for a direct x @ W matmul — semantics are identical.
    w = jax.random.uniform(kw, (input_size, output_size), jnp.float32,
                           minval=-bound, maxval=bound)
    b = jax.random.uniform(kb, (output_size,), jnp.float32,
                           minval=-bound, maxval=bound)
    return w, b


if __name__ == "__main__":
    key = jax.random.PRNGKey(0)
    kx, kp = jax.random.split(key)

    batch, input_size, output_size = 8, 32, 16
    x = jax.random.normal(kx, (batch, input_size), jnp.float32)
    w, b = init_params(kp, input_size, output_size)
    w_packed, b_packed = pack_params(w, b)

    out = gate_network(x, w_packed, b_packed, output_size)
    jax.block_until_ready(out)

    # Reference check against plain JAX (== PyTorch forward semantics).
    ref = jax.nn.sigmoid(x @ w + b[None, :])
    assert out.shape == (batch, output_size)
    assert jnp.allclose(out, ref, atol=1e-5, rtol=1e-5)

    print("KERNEL_OK")
</pallas_src>

<mosaic_0001>
module attributes {stable_mosaic.version = 11 : i64} {
  func.func @gate_kernel(%arg0: i32, %arg1: memref<8x128xf32, #tpu.memory_space<vmem>>, %arg2: memref<128x128xf32, #tpu.memory_space<vmem>>, %arg3: memref<1x128xf32, #tpu.memory_space<vmem>>, %arg4: memref<8x128xf32, #tpu.memory_space<vmem>>) attributes {dimension_semantics = [#tpu.dimension_semantics<parallel>], iteration_bounds = array<i64: 1>, scalar_prefetch = 0 : i64, scratch_operands = 0 : i64, tpu.core_type = #tpu.core_type<tc>, window_params = [{transform_indices = @transform_0, window_bounds = array<i64: 8, 128>}, {pipeline_mode = #tpu.pipeline_mode<synchronous>, transform_indices = @transform_1, window_bounds = array<i64: 128, 128>}, {pipeline_mode = #tpu.pipeline_mode<synchronous>, transform_indices = @transform_2, window_bounds = array<i64: 1, 128>}, {transform_indices = @transform_3, window_bounds = array<i64: 8, 128>}]} {
    %c0 = arith.constant 0 : index
    %c0_0 = arith.constant 0 : index
    %0 = vector.load %arg1[%c0, %c0_0] : memref<8x128xf32, #tpu.memory_space<vmem>>, vector<8x128xf32>
    %c0_1 = arith.constant 0 : index
    %c0_2 = arith.constant 0 : index
    %1 = vector.load %arg2[%c0_1, %c0_2] : memref<128x128xf32, #tpu.memory_space<vmem>>, vector<128x128xf32>
    %cst = arith.constant dense<0.000000e+00> : vector<8x128xf32>
    %2 = tpu.matmul %0, %1, %cst {dimension_numbers = #tpu.dot_dimension_numbers<[1], [0], [0], [1], [0, 0, 1, 1], [], []>} : vector<8x128xf32>, vector<128x128xf32>, vector<8x128xf32> -> vector<8x128xf32>
    %c0_3 = arith.constant 0 : index
    %c0_4 = arith.constant 0 : index
    %3 = vector.load %arg3[%c0_3, %c0_4] : memref<1x128xf32, #tpu.memory_space<vmem>>, vector<1x128xf32>
    %4 = vector.broadcast %3 : vector<1x128xf32> to vector<8x128xf32>
    %5 = arith.addf %2, %4 : vector<8x128xf32>
    %6 = arith.negf %5 : vector<8x128xf32>
    %7 = math.exp %6 : vector<8x128xf32>
    %cst_5 = arith.constant 1.000000e+00 : f32
    %8 = vector.broadcast %cst_5 : f32 to vector<8x128xf32>
    %9 = arith.addf %8, %7 : vector<8x128xf32>
    %10 = arith.divf %8, %9 : vector<8x128xf32>
    %c0_6 = arith.constant 0 : index
    %c0_7 = arith.constant 0 : index
    %11 = vector.load %arg4[%c0_6, %c0_7] : memref<8x128xf32, #tpu.memory_space<vmem>>, vector<8x128xf32>
    tpu.vector_store %arg4[%c0_6, %c0_7], %10 {strides = array<i32>} : memref<8x128xf32, #tpu.memory_space<vmem>>, vector<8x128xf32>,
    return
  }
  func.func @transform_0(%arg0: i32) -> (i32, i32) {
    %c0_i32 = arith.constant 0 : i32
    %c0_i32_0 = arith.constant 0 : i32
    return %arg0, %c0_i32 : i32, i32
  }
  func.func @transform_1(%arg0: i32) -> (i32, i32) {
    %c0_i32 = arith.constant 0 : i32
    %c0_i32_0 = arith.constant 0 : i32
    %c0_i32_1 = arith.constant 0 : i32
    return %c0_i32, %c0_i32_0 : i32, i32
  }
  func.func @transform_2(%arg0: i32) -> (i32, i32) {
    %c0_i32 = arith.constant 0 : i32
    %c0_i32_0 = arith.constant 0 : i32
    %c0_i32_1 = arith.constant 0 : i32
    return %c0_i32, %c0_i32_0 : i32, i32
  }
  func.func @transform_3(%arg0: i32) -> (i32, i32) {
    %c0_i32 = arith.constant 0 : i32
    %c0_i32_0 = arith.constant 0 : i32
    return %arg0, %c0_i32 : i32, i32
  }
}

</mosaic_0001>

<bundles_post_ra>
// kernel: tpu_custom_call.1
= control target key start
LH: loop header
LB: loop body
LE: loop exit
PB: predicated region body
PF: predicated region fallthrough
CT: control target
= control target key end

     0   :  { %8 = vsyncpa [#allocation3], 0  ;;  %s394_s0 = inlined_call_operand.hbm [shape: f32[8,128], index: 0, kind: input, shape index: {}]   ;;  %s395_s1 = inlined_call_operand.hbm [shape: f32[128,128], index: 1, kind: input, shape index: {}]   ;;  %s396_s2 = inlined_call_operand.vmem [shape: f32[1,128], index: 2, kind: input, shape index: {}]   ;;  %s397_s3 = inlined_call_operand.hbm [shape: f32[8,128], index: 3, kind: output, shape index: {}]  }
   0x1   :  { %9 = vsyncpa [#allocation6], 0 }
   0x2   :  { %10 = vsyncpa [#allocation4], 0  ;;  %s320_s12 = smov [#allocation2]   ;;  %s321_s14 = smov [#allocation5]  }
   0x3   :  { %s17_s13 = sshll.u32 %s320_s12, 4  ;;  %s26_s15 = sshll.u32 %s321_s14, 4  ;;  %s18_s13 = int_to_ptr.vmem [resolvable:$true] %s17_s13  ;;  %s348_s15 = int_to_ptr.vmem [resolvable:$true] %s26_s15 }
   0x4   :  { %s248_s18 = scalar_lea.hbm %s394_s0, 128 }
   0x5   :  { %p249_p0 = scmp.ne.s32.totalorder %s394_s0, %s248_s18  ;;  %p252_p1 = scmp.lt.u32.totalorder %s248_s18, %s394_s0 }
   0x7   :  { %p254_p2 = pnand %p252_p1, %p249_p0 }
   0x9   :  { %257 = shalt.err (!%p254_p2)
}
   0xa   :  { %s258_s23 = scalar_lea.vmem %s18_s13, 128  ;;  %p263_p4 = scmp.lt.s32.totalorder %s18_s13, %s18_s13 }
   0xb   :  { %p259_p3 = scmp.ne.s32.totalorder %s18_s13, %s258_s23  ;;  %p264_p5 = scmp.lt.s32.totalorder %s258_s23, %s258_s23 }
   0xd   :  { %p265_p6 = por %p264_p5, %p263_p4 }
   0xf   :  { %p266_p7 = pnand %p265_p6, %p259_p3 }
  0x11   :  { %269 = shalt.err (!%p266_p7)
}
  0x12   :  { %20 = dma.hbm_to_vmem [thread:$0]  %s394_s0, 128, %s18_s13, [#allocation3]  }
  0x13   :  { %s270_s28 = scalar_lea.hbm %s395_s1, 2048 }
  0x14   :  { %p271_p8 = scmp.ne.s32.totalorder %s395_s1, %s270_s28  ;;  %p274_p9 = scmp.lt.u32.totalorder %s270_s28, %s395_s1 }
  0x16   :  { %p276_p10 = pnand %p274_p9, %p271_p8 }
  0x18   :  { %279 = shalt.err (!%p276_p10)
}
  0x19   :  { %s280_s6 = scalar_lea.vmem %s348_s15, 2048  ;;  %p285_p12 = scmp.lt.s32.totalorder %s348_s15, %s348_s15 }
  0x1a   :  { %p281_p11 = scmp.ne.s32.totalorder %s348_s15, %s280_s6  ;;  %p286_p13 = scmp.lt.s32.totalorder %s280_s6, %s280_s6 }
  0x1c   :  { %p287_p0 = por %p286_p13, %p285_p12 }
  0x1e   :  { %p288_p1 = pnand %p287_p0, %p281_p11 }
  0x20   :  { %291 = shalt.err (!%p288_p1)
}
  0x21   :  { %s322_s0 = smov 128   ;;  %s323_s7 = smov 8  }
  0x22   :  { %32 = dma.hbm_to_vmem [thread:$0]  %s395_s1, 2048, %s348_s15, [#allocation6], %s322_s0, %s322_s0, %s323_s7  }
  0x23   :  { %314 = dma.done.wait [#allocation3], 128  }
  0x24   :  { %315 = vsyncadd [#allocation3], 4294967168 }
  0x25   :  { %316 = dma.done.wait [#allocation6], 2048  }
  0x26   :  { %317 = vsyncadd [#allocation6], 4294965248  ;;  %v324_v0 = vmov 0.0|0.0   ;;  %vm325_vm0 = vmmov 0   ;;  %v326_v1 = vmov 0.0   ;;  %v42_v2 = vld [vmem:[#allocation5] sm:$0xff] }
  0x27   :  { %212 = vmatprep.subr.bf16.mxu0 %v324_v0  ;;  %209 = vmatprep.mubr.msk.f32.mxu0 %vm325_vm0, %v326_v1  ;;  %v43_v3 = vld [vmem:[#allocation5 + $0x8] sm:$0xff]  ;;  %v44_v4 = vld [vmem:[#allocation5 + $0x10] sm:$0xff]  ;;  %v45_v6 = vld [vmem:[#allocation5 + $0x18] sm:$0xff]  ;;  %s327_s11 = smov [#allocation7]  }
  0x28   :  { %v213_v5 = vpack.c.bf16 %v43_v3, %v42_v2  ;;  %v216_v7 = vpack.c.bf16 %v45_v6, %v44_v4  ;;  %v46_v8 = vld [vmem:[#allocation5 + $0x20] sm:$0xff]  ;;  %v47_v9 = vld [vmem:[#allocation5 + $0x28] sm:$0xff]  ;;  %v48_v11 = vld [vmem:[#allocation5 + $0x30] sm:$0xff]  ;;  %s148_s12 = sshll.u32 %s327_s11, 4  ;;  %s149_s12 = int_to_ptr.vmem [resolvable:$true] %s148_s12 }
  0x29   :  { %v219_v10 = vpack.c.bf16 %v47_v9, %v46_v8  ;;  %v49_v12 = vld [vmem:[#allocation5 + $0x38] sm:$0xff]  ;;  %v50_v14 = vld [vmem:[#allocation5 + $0x40] sm:$0xff]  ;;  %v51_v15 = vld [vmem:[#allocation5 + $0x48] sm:$0xff]  ;;  %s292_s13 = scalar_lea.vmem %s149_s12, 128  ;;  %p297_p3 = scmp.lt.s32.totalorder %s149_s12, %s149_s12 }
  0x2a   :  { %214 = vmatpush3.bf16.msra.mxu0 %v213_v5  ;;  %v222_v13 = vpack.c.bf16 %v49_v12, %v48_v11  ;;  %v225_v16 = vpack.c.bf16 %v51_v15, %v50_v14  ;;  %v52_v17 = vld [vmem:[#allocation5 + $0x50] sm:$0xff]  ;;  %v53_v18 = vld [vmem:[#allocation5 + $0x58] sm:$0xff]  ;;  %v54_v20 = vld [vmem:[#allocation5 + $0x60] sm:$0xff]  ;;  %p293_p2 = scmp.ne.s32.totalorder %s149_s12, %s292_s13  ;;  %p298_p4 = scmp.lt.s32.totalorder %s292_s13, %s292_s13 }
  0x2b   :  { %215 = vmatprep.subr.bf16.mxu0 %v324_v0  ;;  %v228_v19 = vpack.c.bf16 %v53_v18, %v52_v17  ;;  %v55_v21 = vld [vmem:[#allocation5 + $0x68] sm:$0xff]  ;;  %v56_v23 = vld [vmem:[#allocation5 + $0x70] sm:$0xff]  ;;  %v57_v24 = vld [vmem:[#allocation5 + $0x78] sm:$0xff] }
  0x2c   :  { %v231_v22 = vpack.c.bf16 %v55_v21, %v54_v20  ;;  %v234_v25 = vpack.c.bf16 %v57_v24, %v56_v23  ;;  %v41_v26 = vld [vmem:[#allocation2] sm:$0xff]  ;;  %p299_p5 = por %p298_p4, %p297_p3 }
  0x2d   :  { %v158_v27 = vld [vmem:[%s396_s2] ss:$0 sm:$0xff] }
  0x2e   :  { %217 = vmatpush3.bf16.msra.mxu0 %v216_v7  ;;  %p300_p6 = pnand %p299_p5, %p293_p2 }
  0x2f   :  { %218 = vmatprep.subr.bf16.mxu0 %v324_v0 }
  0x32   :  { %220 = vmatpush3.bf16.msra.mxu0 %v219_v10 }
  0x33   :  { %221 = vmatprep.subr.bf16.mxu0 %v324_v0 }
  0x36   :  { %223 = vmatpush3.bf16.msra.mxu0 %v222_v13 }
  0x37   :  { %224 = vmatprep.subr.bf16.mxu0 %v324_v0 }
  0x3a   :  { %226 = vmatpush3.bf16.msra.mxu0 %v225_v16 }
  0x3b   :  { %227 = vmatprep.subr.bf16.mxu0 %v324_v0 }
  0x3e   :  { %229 = vmatpush3.bf16.msra.mxu0 %v228_v19 }
  0x3f   :  { %230 = vmatprep.subr.bf16.mxu0 %v324_v0 }
  0x42   :  { %232 = vmatpush3.bf16.msra.mxu0 %v231_v22 }
  0x43   :  { %233 = vmatprep.subr.bf16.mxu0 %v324_v0 }
  0x46   :  { %235 = vmatpush3.bf16.msra.mxu0 %v234_v25 }
  0x49   :  { %210 = vmatmul.mubr.f32.vlgmr.msra.gmra.mrb[0].mxu0 %v41_v26 }
 0x11c   :  { %v131_v28 = vpop.f32.mrb[0].mxu0 }
 0x11d   :  { %v132_v29 = vadd.f32 %v158_v27, %v131_v28  ;;  %v211_v30 = vpop.f32.mrb[1].mxu0 }
 0x11f   :  { %v159_v31 = vmul.f32 -1.442695, %v132_v29 }
 0x121   :  { %244 = vpow2.f32 %v159_v31 }
 0x12b   :  { %v245_v32 = vpop.eup %244 }
 0x12c   :  { %v138_v33 = vadd.f32 1.0, %v245_v32 }
 0x12e   :  { %246 = vrcp.f32 %v138_v33 }
 0x138   :  { %v247_v34 = vpop.eup %246 }
 0x139   :  { %141 = vst [vmem:[#allocation7] sm:$0xff] %v247_v34 }
 0x13a   :  { %303 = shalt.err (!%p300_p6)
}
 0x13b   :  { %s304_s15 = scalar_lea.hbm %s397_s3, 128 }
 0x13c   :  { %p305_p7 = scmp.ne.s32.totalorder %s397_s3, %s304_s15  ;;  %p308_p8 = scmp.lt.u32.totalorder %s304_s15, %s397_s3 }
 0x13e   :  { %p310_p9 = pnand %p308_p8, %p305_p7 }
 0x140   :  { %313 = shalt.err (!%p310_p9)
}
 0x141   :  { %151 = dma.vmem_to_hbm [thread:$0]  %s149_s12, 128, %s397_s3, [#allocation4]  }
 0x142   :  { %318 = dma.done.wait [#allocation4], 128  }
 0x143   :  { %319 = vsyncadd [#allocation4], 4294967168 }
 0x144   :  { %155 = vsyncpa [#allocation3], 1 }
 0x145   :  { %156 = vsyncpa [#allocation6], 1 }
 0x146   :  { %157 = vsyncpa [#allocation4], 1 }

</bundles_post_ra>
